<compile_context>
chip_gen: v7x
topology: tpu7x:2x2x1
jax: 0.10.0
libtpu: 0.0.40
codegen_flags: <defaults>
</compile_context>

<pallas_src>
import functools

import jax
import jax.numpy as jnp
from jax.experimental import pallas as pl
from jax.experimental.pallas import tpu as pltpu

_MIB = 1024 * 1024


# ---------------------------------------------------------------------------
# hardware / budgeting helpers
# ---------------------------------------------------------------------------
def _tpu_config():
    """Generation-aware (vmem_limit_bytes, device_kind) with safe fallbacks."""
    kind = ""
    try:
        kind = jax.devices()[0].device_kind.lower()
    except Exception:
        pass
    cap = None
    try:
        cap = int(pltpu.get_tpu_info().vmem_capacity_bytes)
    except Exception:
        cap = None
    if cap is None:
        # 128 MiB/core on v4/v5e/v6e; 64 MiB/core on v7x; unknown -> conservative.
        cap = 128 * _MIB if any(v in kind for v in ("v4", "v5", "v6")) else 64 * _MIB
    if cap >= 100 * _MIB:
        limit = 100 * _MIB                                   # 128 MiB parts
    else:
        limit = max(32 * _MIB, min(cap, 64 * _MIB) - 12 * _MIB)   # v7x: ~52 MiB
    return limit, kind


def _pick_row_tile(n, target):
    """Sublane (row) tile: whole array if small, else a multiple of 8 <= target."""
    if n <= target:
        return n
    return max(8, (min(target, n) // 8) * 8)


# ---------------------------------------------------------------------------
# 1/2) Generic residual:  out = x + y    (y = fn(x), outside or in-kernel)
# ---------------------------------------------------------------------------
def _add_kernel(x_ref, y_ref, o_ref):
    o_ref[...] = x_ref[...] + y_ref[...]


def _fused_fn_kernel(fn, x_ref, o_ref):
    x = x_ref[...]
    o_ref[...] = x + fn(x)


def residual(fn, x, *, fuse_fn=False, target_rows=1024):
    """out = x + fn(x).

    fuse_fn=False: fn(x) computed in plain JAX (any fn); only the residual add
        runs in Pallas; output aliases fn(x)'s buffer (requires jit).
    fuse_fn=True : fn must be elementwise (shape/dtype preserving,
        position-independent); it runs inside the kernel so fn(x) is never
        materialized in HBM.
    """
    limit, _ = _tpu_config()
    item = jnp.dtype(x.dtype).itemsize
    orig_shape = x.shape
    total = int(x.size)
    last = orig_shape[-1] if x.ndim else 1

    # Lane-dense 2-D view: last dim a large multiple of 128 when possible.
    if total % 128 == 0:
        cols = 128
        while cols * 2 <= 2048 and total % (cols * 2) == 0:
            cols *= 2
    else:
        cols = last
    rows = total // cols

    n_bufs = 4 if fuse_fn else 6          # double-buffered (x,out) vs (x,y,out)
    budget = int(0.75 * limit)
    cap_rows = max(8, budget // max(1, n_bufs * cols * item))
    tm = _pick_row_tile(rows, min(target_rows, cap_rows))

    spec = pl.BlockSpec((tm, cols), lambda i: (i, 0))
    grid = (pl.cdiv(rows, tm),)
    params = pltpu.CompilerParams(dimension_semantics=("parallel",),
                                  vmem_limit_bytes=limit)
    x2 = x.reshape(rows, cols)

    if fuse_fn:
        out = pl.pallas_call(
            functools.partial(_fused_fn_kernel, fn),
            out_shape=jax.ShapeDtypeStruct((rows, cols), x.dtype),
            grid_spec=pltpu.PrefetchScalarGridSpec(
                num_scalar_prefetch=0, grid=grid,
                in_specs=[spec], out_specs=spec),
            compiler_params=params,
            cost_estimate=pl.CostEstimate(
                flops=10 * total, transcendentals=total,
                bytes_accessed=2 * total * item),
        )(x2)
        return out.reshape(orig_shape)

    y = fn(x)
    if y.shape != x.shape or y.dtype != x.dtype:
        # TODO(synk): broadcasting / dtype-promoting fn -> plain-JAX fallback.
        return x + y
    y2 = y.reshape(rows, cols)
    out = pl.pallas_call(
        _add_kernel,
        out_shape=jax.ShapeDtypeStruct((rows, cols), x.dtype),
        grid_spec=pltpu.PrefetchScalarGridSpec(
            num_scalar_prefetch=0, grid=grid,
            in_specs=[spec, spec], out_specs=spec),
        # Reuse fn(x)'s buffer for the output (y is only a jit-internal
        # intermediate, never observed after this op).
        input_output_aliases={1: 0},
        compiler_params=params,
        cost_estimate=pl.CostEstimate(
            flops=total, transcendentals=0,
            bytes_accessed=3 * total * item),
    )(x2, y2)
    return out.reshape(orig_shape)


# ---------------------------------------------------------------------------
# 3) Fused Residual(Linear(D, D)):  out = x + x @ W + b
# ---------------------------------------------------------------------------
def _linear_wres_kernel(x_ref, w_ref, b_ref, o_ref):
    x = x_ref[...]
    y = jnp.dot(x, w_ref[...], preferred_element_type=jnp.float32)
    o_ref[...] = (x.astype(jnp.float32) + y + b_ref[...]).astype(o_ref.dtype)


def _linear_stream_kernel(x_ref, w_ref, b_ref, o_ref, acc_ref):
    j = pl.program_id(1)
    k = pl.program_id(2)

    @pl.when(k == 0)
    def _():
        acc_ref[...] = jnp.zeros_like(acc_ref)

    acc_ref[...] += jnp.dot(x_ref[...], w_ref[...],
                            preferred_element_type=jnp.float32)

    # tk == tn, so the LHS tile at k == j is exactly the residual block
    # x[i*tm:(i+1)*tm, j*tn:(j+1)*tn]: fold it in here, never re-read x.
    @pl.when(k == j)
    def _():
        acc_ref[...] += x_ref[...].astype(jnp.float32)

    @pl.when(k == pl.num_programs(2) - 1)
    def _():
        o_ref[...] = (acc_ref[...] + b_ref[...]).astype(o_ref.dtype)


def residual_linear(x, w, b, *, compute_dtype=None,
                    target_rows=None, target_cols=None, _force_stream=False):
    """Residual(nn.Linear(D, D)) fused into a single Pallas kernel.

        out[i, j] = x[i, j] + sum_k x[i, k] * w[k, j] + b[j]

    compute_dtype: optionally cast x/W to a narrower matmul dtype (e.g.
        jnp.bfloat16 on v6e/v7x); accumulation, bias and residual math stay
        f32, output is cast back to x.dtype.
    """
    orig_shape = x.shape
    d = orig_shape[-1]
    assert w.shape == (d, d), "residual_linear expects a square (D, D) weight"
    x2 = x.reshape(-1, d)
    n = x2.shape[0]

    limit, kind = _tpu_config()
    budget = int(0.75 * limit)

    # Generation-aware default tiles (AI high enough to feed each MXU).
    if target_rows is None or target_cols is None:
        if "v6" in kind:
            tr, tc = 1024, 1024
        elif "v5" in kind:
            tr, tc = 512, 512
        else:                                  # v7x (64 MiB VMEM) or unknown
            tr, tc = 512, 1024
        target_rows = target_rows or tr
        target_cols = target_cols or tc

    xm = x2 if compute_dtype is None else x2.astype(compute_dtype)
    wm = w if compute_dtype is None else w.astype(compute_dtype)
    b2 = jnp.asarray(b).reshape(1, d).astype(jnp.float32)

    item = jnp.dtype(xm.dtype).itemsize
    w_item = jnp.dtype(wm.dtype).itemsize
    out_item = jnp.dtype(x.dtype).itemsize

    # ---- path (a): whole W resident in VMEM --------------------------------
    if not _force_stream:
        fixed = 2 * d * d * w_item + 2 * d * 4      # W (counted double-buffered) + bias
        if fixed < budget:
            cap_rows = (budget - fixed) // max(1, 2 * d * (item + out_item))
            if cap_rows >= min(n, 8):
                tm = _pick_row_tile(n, min(target_rows, int(cap_rows)))
                grid = (pl.cdiv(n, tm),)
                # NOTE(v7x): if grid == (1,), the two TensorCores cannot split
                # the row axis; tiny-batch callers should prefer residual().
                out = pl.pallas_call(
                    _linear_wres_kernel,
                    out_shape=jax.ShapeDtypeStruct((n, d), x.dtype),
                    grid_spec=pltpu.PrefetchScalarGridSpec(
                        num_scalar_prefetch=0, grid=grid,
                        in_specs=[
                            pl.BlockSpec((tm, d), lambda i: (i, 0)),   # x
                            pl.BlockSpec((d, d), lambda i: (0, 0)),    # W (resident)
                            pl.BlockSpec((1, d), lambda i: (0, 0)),    # bias (f32)
                        ],
                        out_specs=pl.BlockSpec((tm, d), lambda i: (i, 0))),
                    compiler_params=pltpu.CompilerParams(
                        dimension_semantics=("parallel",),
                        vmem_limit_bytes=limit),
                    cost_estimate=pl.CostEstimate(
                        flops=2 * n * d * d, transcendentals=0,
                        bytes_accessed=(n * d * (item + out_item)
                                        + d * d * w_item + d * 4)),
                )(xm, wm, b2)
                return out.reshape(orig_shape)

    # ---- path (b): K-streamed matmul with f32 accumulator ------------------
    def stream_bytes(tm_, tn_):
        return (2 * tm_ * tn_ * item          # x LHS tiles (double-buffered)
                + 2 * tn_ * tn_ * w_item      # W tiles (tk == tn)
                + 2 * tm_ * tn_ * out_item    # out tiles
                + 2 * tn_ * 4                 # bias
                + tm_ * tn_ * 4)              # f32 accumulator scratch

    tm0 = _pick_row_tile(n, target_rows)
    cands = []
    for c in (tm0, 512, 256, 128, 64, 32, 16, 8):
        c = min(c, tm0)
        if c > 0 and (c == n or c % 8 == 0) and c not in cands:
            cands.append(c)

    tm = tn = 0
    t_cap = (min(target_cols, d) // 128) * 128
    for tm_try in cands:
        t = t_cap
        while t >= 128:
            if d % t == 0 and stream_bytes(tm_try, t) <= budget:
                tm, tn = tm_try, t
                break
            t -= 128
        if tn:
            break

    if not tn:
        # No legal lane-aligned tiling (awkward D) -> exact generic fallback.
        return residual(lambda t: t @ w + jnp.asarray(b).reshape(1, d), x)

    grid = (pl.cdiv(n, tm), d // tn, d // tn)   # K (reduction) last, tk == tn
    out = pl.pallas_call(
        _linear_stream_kernel,
        out_shape=jax.ShapeDtypeStruct((n, d), x.dtype),
        grid_spec=pltpu.PrefetchScalarGridSpec(
            num_scalar_prefetch=0, grid=grid,
            in_specs=[
                pl.BlockSpec((tm, tn), lambda i, j, k: (i, k)),   # x (LHS + residual)
                pl.BlockSpec((tn, tn), lambda i, j, k: (k, j)),   # W tile
                pl.BlockSpec((1, tn), lambda i, j, k: (0, j)),    # bias (f32)
            ],
            out_specs=pl.BlockSpec((tm, tn), lambda i, j, k: (i, j)),
            scratch_shapes=[pltpu.VMEM((tm, tn), jnp.float32)]),
        compiler_params=pltpu.CompilerParams(
            dimension_semantics=("parallel", "parallel", "arbitrary"),
            vmem_limit_bytes=limit),
        cost_estimate=pl.CostEstimate(
            flops=2 * n * d * d, transcendentals=0,
            bytes_accessed=(n * d * item * (d // tn)            # x re-streamed per N tile
                            + d * d * w_item * pl.cdiv(n, tm)   # W re-streamed per M tile
                            + n * d * out_item + d * 4)),
    )(xm, wm, b2)
    return out.reshape(orig_shape)


# ---------------------------------------------------------------------------
if __name__ == "__main__":
    key = jax.random.PRNGKey(0)
    k_x, k_w, k_b, k_x2, k_w2, k_b2 = jax.random.split(key, 6)

    batch, seq, hidden = 2, 8, 32
    n = batch * seq                      # rows (sublane axis)
    x = jax.random.normal(k_x, (n, hidden), dtype=jnp.float32)
    w = jax.random.normal(k_w, (hidden, hidden), dtype=jnp.float32) * 0.02
    b = jax.random.normal(k_b, (hidden,), dtype=jnp.float32) * 0.02

    # 1) Generic Residual: fn(x) in plain JAX, residual add in Pallas
    #    (jit so the output can alias fn(x)'s intermediate buffer).
    fn_lin = lambda t: t @ w + b
    out_generic = jax.jit(functools.partial(residual, fn_lin))(x)

    # 2) Elementwise fn fused inside the kernel (no HBM round-trip for fn(x)).
    out_elem = jax.jit(functools.partial(residual, jax.nn.gelu, fuse_fn=True))(x)

    # 3) Fully fused Residual(Linear): W-resident path at this size.
    out_fused = jax.jit(residual_linear)(x, w, b)

    # 4) Exercise the K-streamed path too (still small: 64 x 256).
    xs = jax.random.normal(k_x2, (64, 256), dtype=jnp.float32)
    ws = jax.random.normal(k_w2, (256, 256), dtype=jnp.float32) * 0.02
    bs = jax.random.normal(k_b2, (256,), dtype=jnp.float32) * 0.02
    out_stream = jax.jit(functools.partial(
        residual_linear, target_rows=64, target_cols=128, _force_stream=True)
    )(xs, ws, bs)

    jax.block_until_ready((out_generic, out_elem, out_fused, out_stream))

    ref_lin = x + (x @ w + b)
    ref_elem = x + jax.nn.gelu(x)
    ref_stream = xs + (xs @ ws + bs)
    assert jnp.allclose(out_generic, ref_lin, atol=1e-5, rtol=1e-5)
    assert jnp.allclose(out_elem, ref_elem, atol=1e-5, rtol=1e-5)
    assert jnp.allclose(out_fused, ref_lin, atol=1e-5, rtol=1e-5)
    assert jnp.allclose(out_stream, ref_stream, atol=1e-4, rtol=1e-4)

    print("KERNEL_OK")
</pallas_src>

<mosaic_0001>
module attributes {stable_mosaic.version = 11 : i64} {
  func.func @_add_kernel(%arg0: i32, %arg1: memref<1x512xf32, #tpu.memory_space<vmem>>, %arg2: memref<1x512xf32, #tpu.memory_space<vmem>>, %arg3: memref<1x512xf32, #tpu.memory_space<vmem>>) attributes {dimension_semantics = [#tpu.dimension_semantics<parallel>], iteration_bounds = array<i64: 1>, scalar_prefetch = 0 : i64, scratch_operands = 0 : i64, tpu.core_type = #tpu.core_type<tc>, window_params = [{transform_indices = @transform_0, window_bounds = array<i64: 1, 512>}, {transform_indices = @transform_1, window_bounds = array<i64: 1, 512>}, {transform_indices = @transform_2, window_bounds = array<i64: 1, 512>}]} {
    %c0 = arith.constant 0 : index
    %c0_0 = arith.constant 0 : index
    %0 = vector.load %arg1[%c0, %c0_0] : memref<1x512xf32, #tpu.memory_space<vmem>>, vector<1x512xf32>
    %c0_1 = arith.constant 0 : index
    %c0_2 = arith.constant 0 : index
    %1 = vector.load %arg2[%c0_1, %c0_2] : memref<1x512xf32, #tpu.memory_space<vmem>>, vector<1x512xf32>
    %2 = arith.addf %0, %1 : vector<1x512xf32>
    %c0_3 = arith.constant 0 : index
    %c0_4 = arith.constant 0 : index
    %3 = vector.load %arg3[%c0_3, %c0_4] : memref<1x512xf32, #tpu.memory_space<vmem>>, vector<1x512xf32>
    tpu.vector_store %arg3[%c0_3, %c0_4], %2 {strides = array<i32>} : memref<1x512xf32, #tpu.memory_space<vmem>>, vector<1x512xf32>,
    return
  }
  func.func @transform_0(%arg0: i32) -> (i32, i32) {
    %c0_i32 = arith.constant 0 : i32
    %c0_i32_0 = arith.constant 0 : i32
    return %arg0, %c0_i32 : i32, i32
  }
  func.func @transform_1(%arg0: i32) -> (i32, i32) {
    %c0_i32 = arith.constant 0 : i32
    %c0_i32_0 = arith.constant 0 : i32
    return %arg0, %c0_i32 : i32, i32
  }
  func.func @transform_2(%arg0: i32) -> (i32, i32) {
    %c0_i32 = arith.constant 0 : i32
    %c0_i32_0 = arith.constant 0 : i32
    return %arg0, %c0_i32 : i32, i32
  }
}

</mosaic_0001>

<bundles_post_ra>
// kernel: residual.1
= control target key start
LH: loop header
LB: loop body
LE: loop exit
PB: predicated region body
PF: predicated region fallthrough
CT: control target
= control target key end

     0   :  { %v14_v0 = vlaneseq  ;;  %s47_s0 = inlined_call_operand.vmem [shape: f32[1,512], index: 0, kind: input, shape index: {}]   ;;  %s48_s1 = inlined_call_operand.vmem [shape: f32[1,512], index: 1, kind: input, shape index: {}, may-alias: {1,2}]   ;;  %s49_s2 = inlined_call_operand.vmem [shape: f32[1,512], index: 2, kind: output, shape index: {}, may-alias: {1,2}]  }
   0x1   :  { %v11_v1 = vld [vmem:[%s47_s0] sm:$0xf] }
   0x2   :  { %v12_v2 = vld [vmem:[%s48_s1] sm:$0xf]  ;;  %vm16_vm0 = vcmp.lt.s32.totalorder %v14_v0, 512 }
   0x3   :  { %v13_v3 = vadd.f32 %v12_v2, %v11_v1 }
   0x5   :  { %18 = vst.msk [vmem:[%s49_s2] sm:$0xf] %vm16_vm0, %v13_v3 }

</bundles_post_ra>
